<compile_context>
chip_gen: v7x
topology: tpu7x:2x2x1
jax: 0.10.0
libtpu: 0.0.40
codegen_flags: <defaults>
</compile_context>

<pallas_src>
import functools
import math

import numpy as np
import jax
import jax.numpy as jnp
from jax.experimental import pallas as pl
from jax.experimental.pallas import tpu as pltpu

_NEG_INF = -1e9
_LN_EPS = 1e-6


def _bf16(x):
    return x.astype(jnp.bfloat16)


def _row_tile(m):
    """Largest row-tile (multiple of 8 when tiling) for an (m, D) activation."""
    if m <= 512:
        return m
    for t in (512, 384, 256, 128, 64, 32, 16, 8):
        if m % t == 0:
            return t
    return m


# --------------------- fused multi-head attention sub-layer ---------------------

def _mha_kernel(x_ref, kv_ref, mask_ref, wq_ref, wk_ref, wv_ref, wo_ref,
                g_ref, b_ref, o_ref, *extra_refs,
                n_head, d_k, d_v, eps, return_probs):
    # One batch element per grid step; everything below stays in VMEM.
    attn_ref = extra_refs[0] if return_probs else None

    x = x_ref[...]                       # (Lq, d_model) f32 (residual source)
    kv = kv_ref[...]                     # (Lk, d_model) f32
    keep = mask_ref[...] != 0.0          # (Lq, Lk) bool, True = keep
    scale = 1.0 / math.sqrt(d_k)
    d_model = x.shape[-1]

    # Bias-free QKV projections: bf16 on the MXU, f32 accumulation.
    q = jnp.dot(_bf16(x), _bf16(wq_ref[...]),
                preferred_element_type=jnp.float32) * scale       # (Lq, H*dk)
    k = jnp.dot(_bf16(kv), _bf16(wk_ref[...]),
                preferred_element_type=jnp.float32)               # (Lk, H*dk)
    v = jnp.dot(_bf16(kv), _bf16(wv_ref[...]),
                preferred_element_type=jnp.float32)               # (Lk, H*dv)

    wo = wo_ref[...]                                              # (H*dv, d_model)
    acc = jnp.zeros((x.shape[0], d_model), jnp.float32)

    # Static unroll over heads; per-head scratch never leaves VMEM and the
    # output projection is accumulated head-by-head into a lane-dense slab.
    for h in range(n_head):
        qh = q[:, h * d_k:(h + 1) * d_k]                          # (Lq, dk)
        kh = k[:, h * d_k:(h + 1) * d_k]                          # (Lk, dk)
        vh = v[:, h * d_v:(h + 1) * d_v]                          # (Lk, dv)
        # scores = qh @ kh^T without an explicit transpose (NT dot_general).
        s = jax.lax.dot_general(_bf16(qh), _bf16(kh),
                                (((1,), (1,)), ((), ())),
                                preferred_element_type=jnp.float32)   # (Lq, Lk)
        s = jnp.where(keep, s, _NEG_INF)                          # f32 mask math
        s = s - jnp.max(s, axis=-1, keepdims=True)
        e = jnp.exp(s)
        p = e * pl.reciprocal(jnp.sum(e, axis=-1, keepdims=True), approx=True)
        if return_probs:
            attn_ref[h] = p
        ctx = jnp.dot(_bf16(p), _bf16(vh),
                      preferred_element_type=jnp.float32)         # (Lq, dv)
        acc = acc + jnp.dot(_bf16(ctx), _bf16(wo[h * d_v:(h + 1) * d_v, :]),
                            preferred_element_type=jnp.float32)   # (Lq, d_model)

    # Residual + post-LayerNorm, f32.
    y = acc + x
    mean = jnp.mean(y, axis=-1, keepdims=True)
    var = jnp.mean(jnp.square(y - mean), axis=-1, keepdims=True)
    o_ref[...] = (y - mean) * jax.lax.rsqrt(var + eps) * g_ref[...] + b_ref[...]


def fused_mha(p, q_in, kv_in, mask, n_head, d_k, d_v, return_probs=False):
    """Fused MHA sub-layer: projections + attention + out-proj + add&LN."""
    B, Lq, d_model = q_in.shape
    Lk = kv_in.shape[1]
    # TODO(synk): for long sequences, tile Lq/Lk with a flash-style
    # online-softmax grid axis instead of one (Lq, Lk) block per batch.
    kernel = functools.partial(_mha_kernel, n_head=n_head, d_k=d_k, d_v=d_v,
                               eps=_LN_EPS, return_probs=return_probs)
    in_specs = [
        pl.BlockSpec((None, Lq, d_model), lambda b: (b, 0, 0)),     # q input
        pl.BlockSpec((None, Lk, d_model), lambda b: (b, 0, 0)),     # kv input
        pl.BlockSpec((None, Lq, Lk), lambda b: (b, 0, 0)),          # mask
        pl.BlockSpec((d_model, n_head * d_k), lambda b: (0, 0)),    # w_q
        pl.BlockSpec((d_model, n_head * d_k), lambda b: (0, 0)),    # w_k
        pl.BlockSpec((d_model, n_head * d_v), lambda b: (0, 0)),    # w_v
        pl.BlockSpec((n_head * d_v, d_model), lambda b: (0, 0)),    # w_o
        pl.BlockSpec((1, d_model), lambda b: (0, 0)),               # ln gamma
        pl.BlockSpec((1, d_model), lambda b: (0, 0)),               # ln beta
    ]
    out_shapes = [jax.ShapeDtypeStruct((B, Lq, d_model), jnp.float32)]
    out_specs = [pl.BlockSpec((None, Lq, d_model), lambda b: (b, 0, 0))]
    if return_probs:
        out_shapes.append(jax.ShapeDtypeStruct((B, n_head, Lq, Lk), jnp.float32))
        out_specs.append(
            pl.BlockSpec((None, n_head, Lq, Lk), lambda b: (b, 0, 0, 0)))

    res = pl.pallas_call(
        kernel,
        grid=(B,),
        in_specs=in_specs,
        out_specs=tuple(out_specs) if return_probs else out_specs[0],
        out_shape=tuple(out_shapes) if return_probs else out_shapes[0],
        compiler_params=pltpu.CompilerParams(
            dimension_semantics=("parallel",)),
    )(q_in, kv_in, mask,
      p["w_q"], p["w_k"], p["w_v"], p["w_o"],
      p["ln_g"].reshape(1, d_model), p["ln_b"].reshape(1, d_model))

    if return_probs:
        return res[0], res[1]
    return res, None


# ------------------------- fused position-wise FFN sub-layer -------------------------

def _ffn_kernel(x_ref, w1_ref, b1_ref, w2_ref, b2_ref, g_ref, b_ref, o_ref, *, eps):
    x = x_ref[...]                                                 # (tm, d_model)
    h = jnp.dot(_bf16(x), _bf16(w1_ref[...]),
                preferred_element_type=jnp.float32) + b1_ref[...]  # (tm, d_inner)
    h = jnp.maximum(h, 0.0)
    y = jnp.dot(_bf16(h), _bf16(w2_ref[...]),
                preferred_element_type=jnp.float32) + b2_ref[...]  # (tm, d_model)
    y = y + x                                                      # residual
    mean = jnp.mean(y, axis=-1, keepdims=True)
    var = jnp.mean(jnp.square(y - mean), axis=-1, keepdims=True)
    o_ref[...] = (y - mean) * jax.lax.rsqrt(var + eps) * g_ref[...] + b_ref[...]


def fused_ffn(p, x):
    B, L, D = x.shape
    M = B * L
    d_inner = p["w1"].shape[1]
    tm = _row_tile(M)
    out = pl.pallas_call(
        functools.partial(_ffn_kernel, eps=_LN_EPS),
        grid=(M // tm,),
        in_specs=[
            pl.BlockSpec((tm, D), lambda i: (i, 0)),
            pl.BlockSpec((D, d_inner), lambda i: (0, 0)),
            pl.BlockSpec((1, d_inner), lambda i: (0, 0)),
            pl.BlockSpec((d_inner, D), lambda i: (0, 0)),
            pl.BlockSpec((1, D), lambda i: (0, 0)),
            pl.BlockSpec((1, D), lambda i: (0, 0)),
            pl.BlockSpec((1, D), lambda i: (0, 0)),
        ],
        out_specs=pl.BlockSpec((tm, D), lambda i: (i, 0)),
        out_shape=jax.ShapeDtypeStruct((M, D), jnp.float32),
        compiler_params=pltpu.CompilerParams(
            dimension_semantics=("parallel",)),
    )(x.reshape(M, D), p["w1"], p["b1"].reshape(1, d_inner), p["w2"],
      p["b2"].reshape(1, D), p["ln_g"].reshape(1, D), p["ln_b"].reshape(1, D))
    return out.reshape(B, L, D)


# ------------------------------ small helper kernels ------------------------------

def _layernorm_kernel(x_ref, g_ref, b_ref, o_ref, *, eps):
    x = x_ref[...]
    mean = jnp.mean(x, axis=-1, keepdims=True)
    var = jnp.mean(jnp.square(x - mean), axis=-1, keepdims=True)
    o_ref[...] = (x - mean) * jax.lax.rsqrt(var + eps) * g_ref[...] + b_ref[...]


def layernorm(x, gamma, beta, eps=_LN_EPS):
    # Pure LayerNorm (no residual, no zeros DMA) over the feature axis.
    B, L, D = x.shape
    M = B * L
    tm = _row_tile(M)
    out = pl.pallas_call(
        functools.partial(_layernorm_kernel, eps=eps),
        grid=(M // tm,),
        in_specs=[pl.BlockSpec((tm, D), lambda i: (i, 0)),
                  pl.BlockSpec((1, D), lambda i: (0, 0)),
                  pl.BlockSpec((1, D), lambda i: (0, 0))],
        out_specs=pl.BlockSpec((tm, D), lambda i: (i, 0)),
        out_shape=jax.ShapeDtypeStruct((M, D), jnp.float32),
        compiler_params=pltpu.CompilerParams(
            dimension_semantics=("parallel",)),
    )(x.reshape(M, D), gamma.reshape(1, D), beta.reshape(1, D))
    return out.reshape(B, L, D)


def _add_pos_kernel(x_ref, pos_ref, o_ref):
    o_ref[...] = x_ref[...] + pos_ref[...]


def add_pos_encoding(x, pos):
    # x: (B, L, D); pos: (1, L, D) — PositionalEncoding.forward broadcast add.
    B, L, D = x.shape
    return pl.pallas_call(
        _add_pos_kernel,
        grid=(B,),
        in_specs=[pl.BlockSpec((None, L, D), lambda b: (b, 0, 0)),
                  pl.BlockSpec((None, L, D), lambda b: (0, 0, 0))],
        out_specs=pl.BlockSpec((None, L, D), lambda b: (b, 0, 0)),
        out_shape=jax.ShapeDtypeStruct((B, L, D), jnp.float32),
        compiler_params=pltpu.CompilerParams(
            dimension_semantics=("parallel",)),
    )(x, pos)


# ------------------------------- model (JAX glue) -------------------------------

def get_sin_encoding_table(n_position, d_hid):
    position = np.arange(n_position, dtype=np.float64)[:, None]
    idx = np.arange(d_hid)[None, :]
    angle = position / np.power(10000.0, 2 * (idx // 2) / d_hid)
    table = np.zeros((n_position, d_hid), dtype=np.float64)
    table[:, 0::2] = np.sin(angle[:, 0::2])
    table[:, 1::2] = np.cos(angle[:, 1::2])
    return jnp.asarray(table[None], dtype=jnp.float32)  # (1, n_position, d_hid)


def decoder_layer(p, dec_input, enc_output, slf_mask, enc_mask,
                  n_head, d_k, d_v, return_attns):
    out, slf_attn = fused_mha(p["slf_attn"], dec_input, dec_input, slf_mask,
                              n_head, d_k, d_v, return_probs=return_attns)
    out, enc_attn = fused_mha(p["enc_attn"], out, enc_output, enc_mask,
                              n_head, d_k, d_v, return_probs=return_attns)
    out = fused_ffn(p["ffn"], out)
    return out, slf_attn, enc_attn


def decoder_forward(params, seq, dec_mask, encoder_output, enc_mask, cfg,
                    return_attns=False):
    n_head, d_k, d_v = cfg["n_head"], cfg["d_k"], cfg["d_v"]
    B, L = seq.shape
    # Embedding lookup stays as an XLA gather (padding row is zeroed in params).
    emb = jnp.take(params["embed"], seq, axis=0)            # (B, L, embed_dim)
    pos = params["pos_table"][:, :L]                         # (1, L, embed_dim)
    x = add_pos_encoding(emb, pos)
    # dropout(p=0.1) -> identity at inference
    slf_list, enc_list = [], []
    for lp in params["layers"]:
        x, sa, ea = decoder_layer(lp, x, encoder_output, dec_mask, enc_mask,
                                  n_head, d_k, d_v, return_attns)
        if return_attns:
            slf_list.append(sa)
            enc_list.append(ea)
    x = layernorm(x, params["ln_g"], params["ln_b"])
    if return_attns:
        return x, slf_list, enc_list
    return (x,)


# ------------------------------- parameter init -------------------------------

def _normal(key, shape, scale=0.02):
    return scale * jax.random.normal(key, shape, dtype=jnp.float32)


def init_mha_params(key, d_model, n_head, d_k, d_v):
    ks = jax.random.split(key, 4)
    return {
        "w_q": _normal(ks[0], (d_model, n_head * d_k)),
        "w_k": _normal(ks[1], (d_model, n_head * d_k)),
        "w_v": _normal(ks[2], (d_model, n_head * d_v)),
        "w_o": _normal(ks[3], (n_head * d_v, d_model)),
        "ln_g": jnp.ones((d_model,), jnp.float32),
        "ln_b": jnp.zeros((d_model,), jnp.float32),
    }


def init_params(key, cfg):
    vocab, embed_dim = cfg["vocab_size"], cfg["embed_dim"]
    d_model, d_inner = cfg["d_model"], cfg["d_inner"]
    n_head, d_k, d_v = cfg["n_head"], cfg["d_k"], cfg["d_v"]
    keys = jax.random.split(key, 2 + cfg["n_layers"])
    embed = _normal(keys[0], (vocab, embed_dim))
    embed = embed.at[cfg["pad_idx"]].set(0.0)                # padding_idx row
    layers = []
    for i in range(cfg["n_layers"]):
        lk = jax.random.split(keys[2 + i], 4)
        layers.append({
            "slf_attn": init_mha_params(lk[0], d_model, n_head, d_k, d_v),
            "enc_attn": init_mha_params(lk[1], d_model, n_head, d_k, d_v),
            "ffn": {
                "w1": _normal(lk[2], (d_model, d_inner)),
                "b1": jnp.zeros((d_inner,), jnp.float32),
                "w2": _normal(lk[3], (d_inner, d_model)),
                "b2": jnp.zeros((d_model,), jnp.float32),
                "ln_g": jnp.ones((d_model,), jnp.float32),
                "ln_b": jnp.zeros((d_model,), jnp.float32),
            },
        })
    return {
        "embed": embed,
        "pos_table": get_sin_encoding_table(cfg["n_position"], embed_dim),
        "layers": layers,
        "ln_g": jnp.ones((d_model,), jnp.float32),
        "ln_b": jnp.zeros((d_model,), jnp.float32),
    }


# ------------------------------------- main -------------------------------------

if __name__ == "__main__":
    cfg = dict(vocab_size=32, embed_dim=32, n_layers=2, n_head=2,
               d_k=16, d_v=16, d_model=32, d_inner=64,
               pad_idx=0, n_position=200)
    B, L, Le = 2, 8, 8

    root = jax.random.PRNGKey(0)
    k_param, k_seq, k_enc = jax.random.split(root, 3)

    params = init_params(k_param, cfg)

    seq = jax.random.randint(k_seq, (B, L), 1, cfg["vocab_size"], dtype=jnp.int32)
    seq = seq.at[1, -2:].set(cfg["pad_idx"])                 # some padding tokens

    encoder_output = jax.random.normal(k_enc, (B, Le, cfg["d_model"]),
                                       dtype=jnp.float32)

    # decoder self-attn mask: pad mask & causal mask -> (B, L, L); 1 = keep.
    pad_keep = (seq != cfg["pad_idx"]).astype(jnp.float32)           # (B, L)
    causal = jnp.tril(jnp.ones((L, L), jnp.float32))
    dec_mask = pad_keep[:, None, :] * causal[None, :, :]             # (B, L, L)
    # enc-dec attn mask: encoder pad mask broadcast over query positions.
    enc_keep = jnp.ones((B, Le), jnp.float32)
    enc_mask = jnp.broadcast_to(enc_keep[:, None, :], (B, L, Le)).astype(jnp.float32)

    fwd = jax.jit(functools.partial(decoder_forward, cfg=cfg, return_attns=False))
    (dec_output,) = fwd(params, seq, dec_mask, encoder_output, enc_mask)
    dec_output = jax.block_until_ready(dec_output)

    assert dec_output.shape == (B, L, cfg["d_model"])
    assert bool(jnp.all(jnp.isfinite(dec_output)))
    print("KERNEL_OK")
</pallas_src>

<mosaic_0001>
module attributes {stable_mosaic.version = 11 : i64} {
  func.func @_add_pos_kernel(%arg0: i32, %arg1: memref<1x8x32xf32, #tpu.memory_space<vmem>>, %arg2: memref<1x8x32xf32, #tpu.memory_space<vmem>>, %arg3: memref<1x8x32xf32, #tpu.memory_space<vmem>>) attributes {dimension_semantics = [#tpu.dimension_semantics<parallel>], iteration_bounds = array<i64: 2>, scalar_prefetch = 0 : i64, scratch_operands = 0 : i64, tpu.core_type = #tpu.core_type<tc>, window_params = [{transform_indices = @transform_0, window_bounds = array<i64: 1, 8, 32>}, {pipeline_mode = #tpu.pipeline_mode<synchronous>, transform_indices = @transform_1, window_bounds = array<i64: 1, 8, 32>}, {transform_indices = @transform_2, window_bounds = array<i64: 1, 8, 32>}]} {
    %c0 = arith.constant 0 : index
    %c0_0 = arith.constant 0 : index
    %c0_1 = arith.constant 0 : index
    %0 = vector.load %arg1[%c0, %c0_0, %c0_1] : memref<1x8x32xf32, #tpu.memory_space<vmem>>, vector<1x8x32xf32>
    %1 = vector.shape_cast %0 : vector<1x8x32xf32> to vector<8x32xf32>
    %c0_2 = arith.constant 0 : index
    %c0_3 = arith.constant 0 : index
    %c0_4 = arith.constant 0 : index
    %2 = vector.load %arg2[%c0_2, %c0_3, %c0_4] : memref<1x8x32xf32, #tpu.memory_space<vmem>>, vector<1x8x32xf32>
    %3 = vector.shape_cast %2 : vector<1x8x32xf32> to vector<8x32xf32>
    %4 = arith.addf %1, %3 : vector<8x32xf32>
    %c0_5 = arith.constant 0 : index
    %c0_6 = arith.constant 0 : index
    %c0_7 = arith.constant 0 : index
    %5 = vector.load %arg3[%c0_5, %c0_6, %c0_7] : memref<1x8x32xf32, #tpu.memory_space<vmem>>, vector<1x8x32xf32>
    %6 = vector.shape_cast %5 : vector<1x8x32xf32> to vector<8x32xf32>
    %7 = vector.shape_cast %4 : vector<8x32xf32> to vector<1x8x32xf32>
    tpu.vector_store %arg3[%c0_5, %c0_6, %c0_7], %7 {strides = array<i32>} : memref<1x8x32xf32, #tpu.memory_space<vmem>>, vector<1x8x32xf32>,
    return
  }
  func.func @transform_0(%arg0: i32) -> (i32, i32, i32) {
    %c0_i32 = arith.constant 0 : i32
    %c0_i32_0 = arith.constant 0 : i32
    %c0_i32_1 = arith.constant 0 : i32
    return %arg0, %c0_i32, %c0_i32_0 : i32, i32, i32
  }
  func.func @transform_1(%arg0: i32) -> (i32, i32, i32) {
    %c0_i32 = arith.constant 0 : i32
    %c0_i32_0 = arith.constant 0 : i32
    %c0_i32_1 = arith.constant 0 : i32
    %c0_i32_2 = arith.constant 0 : i32
    return %c0_i32, %c0_i32_0, %c0_i32_1 : i32, i32, i32
  }
  func.func @transform_2(%arg0: i32) -> (i32, i32, i32) {
    %c0_i32 = arith.constant 0 : i32
    %c0_i32_0 = arith.constant 0 : i32
    %c0_i32_1 = arith.constant 0 : i32
    return %arg0, %c0_i32, %c0_i32_0 : i32, i32, i32
  }
}

module attributes {stable_mosaic.version = 11 : i64} {
  func.func @_mha_kernel(%arg0: i32, %arg1: memref<1x8x32xf32, #tpu.memory_space<vmem>>, %arg2: memref<1x8x32xf32, #tpu.memory_space<vmem>>, %arg3: memref<1x8x8xf32, #tpu.memory_space<vmem>>, %arg4: memref<32x32xf32, #tpu.memory_space<vmem>>, %arg5: memref<32x32xf32, #tpu.memory_space<vmem>>, %arg6: memref<32x32xf32, #tpu.memory_space<vmem>>, %arg7: memref<32x32xf32, #tpu.memory_space<vmem>>, %arg8: memref<1x32xf32, #tpu.memory_space<vmem>>, %arg9: memref<1x32xf32, #tpu.memory_space<vmem>>, %arg10: memref<1x8x32xf32, #tpu.memory_space<vmem>>) attributes {dimension_semantics = [#tpu.dimension_semantics<parallel>], iteration_bounds = array<i64: 2>, scalar_prefetch = 0 : i64, scratch_operands = 0 : i64, tpu.core_type = #tpu.core_type<tc>, window_params = [{transform_indices = @transform_0, window_bounds = array<i64: 1, 8, 32>}, {transform_indices = @transform_1, window_bounds = array<i64: 1, 8, 32>}, {transform_indices = @transform_2, window_bounds = array<i64: 1, 8, 8>}, {pipeline_mode = #tpu.pipeline_mode<synchronous>, transform_indices = @transform_3, window_bounds = array<i64: 32, 32>}, {pipeline_mode = #tpu.pipeline_mode<synchronous>, transform_indices = @transform_4, window_bounds = array<i64: 32, 32>}, {pipeline_mode = #tpu.pipeline_mode<synchronous>, transform_indices = @transform_5, window_bounds = array<i64: 32, 32>}, {pipeline_mode = #tpu.pipeline_mode<synchronous>, transform_indices = @transform_6, window_bounds = array<i64: 32, 32>}, {pipeline_mode = #tpu.pipeline_mode<synchronous>, transform_indices = @transform_7, window_bounds = array<i64: 1, 32>}, {pipeline_mode = #tpu.pipeline_mode<synchronous>, transform_indices = @transform_8, window_bounds = array<i64: 1, 32>}, {transform_indices = @transform_9, window_bounds = array<i64: 1, 8, 32>}]} {
    %c0 = arith.constant 0 : index
    %c0_0 = arith.constant 0 : index
    %c0_1 = arith.constant 0 : index
    %0 = vector.load %arg1[%c0, %c0_0, %c0_1] : memref<1x8x32xf32, #tpu.memory_space<vmem>>, vector<1x8x32xf32>
    %1 = vector.shape_cast %0 : vector<1x8x32xf32> to vector<8x32xf32>
    %c0_2 = arith.constant 0 : index
    %c0_3 = arith.constant 0 : index
    %c0_4 = arith.constant 0 : index
    %2 = vector.load %arg2[%c0_2, %c0_3, %c0_4] : memref<1x8x32xf32, #tpu.memory_space<vmem>>, vector<1x8x32xf32>
    %3 = vector.shape_cast %2 : vector<1x8x32xf32> to vector<8x32xf32>
    %c0_5 = arith.constant 0 : index
    %c0_6 = arith.constant 0 : index
    %c0_7 = arith.constant 0 : index
    %4 = vector.load %arg3[%c0_5, %c0_6, %c0_7] : memref<1x8x8xf32, #tpu.memory_space<vmem>>, vector<1x8x8xf32>
    %5 = vector.shape_cast %4 : vector<1x8x8xf32> to vector<8x8xf32>
    %cst = arith.constant 0.000000e+00 : f32
    %6 = vector.broadcast %cst : f32 to vector<8x8xf32>
    %7 = arith.cmpf one, %5, %6 : vector<8x8xf32>
    %8 = arith.truncf %1 : vector<8x32xf32> to vector<8x32xbf16>
    %c0_8 = arith.constant 0 : index
    %c0_9 = arith.constant 0 : index
    %9 = vector.load %arg4[%c0_8, %c0_9] : memref<32x32xf32, #tpu.memory_space<vmem>>, vector<32x32xf32>
    %10 = arith.truncf %9 : vector<32x32xf32> to vector<32x32xbf16>
    %cst_10 = arith.constant dense<0.000000e+00> : vector<8x32xf32>
    %11 = tpu.matmul %8, %10, %cst_10 {dimension_numbers = #tpu.dot_dimension_numbers<[1], [0], [0], [1], [0, 0, 1, 1], [], []>} : vector<8x32xbf16>, vector<32x32xbf16>, vector<8x32xf32> -> vector<8x32xf32>
    %cst_11 = arith.constant 2.500000e-01 : f32
    %12 = vector.broadcast %cst_11 : f32 to vector<8x32xf32>
    %13 = arith.mulf %11, %12 : vector<8x32xf32>
    %14 = arith.truncf %3 : vector<8x32xf32> to vector<8x32xbf16>
    %c0_12 = arith.constant 0 : index
    %c0_13 = arith.constant 0 : index
    %15 = vector.load %arg5[%c0_12, %c0_13] : memref<32x32xf32, #tpu.memory_space<vmem>>, vector<32x32xf32>
    %16 = arith.truncf %15 : vector<32x32xf32> to vector<32x32xbf16>
    %cst_14 = arith.constant dense<0.000000e+00> : vector<8x32xf32>
    %17 = tpu.matmul %14, %16, %cst_14 {dimension_numbers = #tpu.dot_dimension_numbers<[1], [0], [0], [1], [0, 0, 1, 1], [], []>} : vector<8x32xbf16>, vector<32x32xbf16>, vector<8x32xf32> -> vector<8x32xf32>
    %18 = arith.truncf %3 : vector<8x32xf32> to vector<8x32xbf16>
    %c0_15 = arith.constant 0 : index
    %c0_16 = arith.constant 0 : index
    %19 = vector.load %arg6[%c0_15, %c0_16] : memref<32x32xf32, #tpu.memory_space<vmem>>, vector<32x32xf32>
    %20 = arith.truncf %19 : vector<32x32xf32> to vector<32x32xbf16>
    %cst_17 = arith.constant dense<0.000000e+00> : vector<8x32xf32>
    %21 = tpu.matmul %18, %20, %cst_17 {dimension_numbers = #tpu.dot_dimension_numbers<[1], [0], [0], [1], [0, 0, 1, 1], [], []>} : vector<8x32xbf16>, vector<32x32xbf16>, vector<8x32xf32> -> vector<8x32xf32>
    %c0_18 = arith.constant 0 : index
    %c0_19 = arith.constant 0 : index
    %22 = vector.load %arg7[%c0_18, %c0_19] : memref<32x32xf32, #tpu.memory_space<vmem>>, vector<32x32xf32>
    %cst_20 = arith.constant 0.000000e+00 : f32
    %23 = vector.broadcast %cst_20 : f32 to vector<8x32xf32>
    %24 = vector.extract_strided_slice %13 {offsets = [0, 0], sizes = [8, 16], strides = [1, 1]} : vector<8x32xf32> to vector<8x16xf32>
    %25 = vector.extract_strided_slice %17 {offsets = [0, 0], sizes = [8, 16], strides = [1, 1]} : vector<8x32xf32> to vector<8x16xf32>
    %26 = vector.extract_strided_slice %21 {offsets = [0, 0], sizes = [8, 16], strides = [1, 1]} : vector<8x32xf32> to vector<8x16xf32>
    %27 = arith.truncf %24 : vector<8x16xf32> to vector<8x16xbf16>
    %28 = arith.truncf %25 : vector<8x16xf32> to vector<8x16xbf16>
    %cst_21 = arith.constant dense<0.000000e+00> : vector<8x8xf32>
    %29 = tpu.matmul %27, %28, %cst_21 {dimension_numbers = #tpu.dot_dimension_numbers<[1], [1], [0], [0], [0, 0, 1, 0], [], []>} : vector<8x16xbf16>, vector<8x16xbf16>, vector<8x8xf32> -> vector<8x8xf32>
    %cst_22 = arith.constant -1.000000e+09 : f32
    %30 = vector.broadcast %cst_22 : f32 to vector<8x8xf32>
    %31 = arith.select %7, %29, %30 : vector<8x8xi1>, vector<8x8xf32>
    %cst_23 = arith.constant dense<0xFF800000> : vector<8xf32>
    %32 = vector.multi_reduction <maximumf>, %31, %cst_23 [1] : vector<8x8xf32> to vector<8xf32>
    %33 = vector.shape_cast %32 : vector<8xf32> to vector<8x1xf32>
    %34 = vector.broadcast %33 : vector<8x1xf32> to vector<8x8xf32>
    %35 = arith.subf %31, %34 : vector<8x8xf32>
    %36 = math.exp %35 : vector<8x8xf32>
    %cst_24 = arith.constant dense<0.000000e+00> : vector<8xf32>
    %37 = vector.multi_reduction <add>, %36, %cst_24 [1] : vector<8x8xf32> to vector<8xf32>
    %38 = vector.shape_cast %37 : vector<8xf32> to vector<8x1xf32>
    %39 = tpu.reciprocal %38 {approx = true} : vector<8x1xf32> -> vector<8x1xf32>
    %40 = vector.broadcast %39 : vector<8x1xf32> to vector<8x8xf32>
    %41 = arith.mulf %36, %40 : vector<8x8xf32>
    %42 = arith.truncf %41 : vector<8x8xf32> to vector<8x8xbf16>
    %43 = arith.truncf %26 : vector<8x16xf32> to vector<8x16xbf16>
    %cst_25 = arith.constant dense<0.000000e+00> : vector<8x16xf32>
    %44 = tpu.matmul %42, %43, %cst_25 {dimension_numbers = #tpu.dot_dimension_numbers<[1], [0], [0], [1], [0, 0, 1, 1], [], []>} : vector<8x8xbf16>, vector<8x16xbf16>, vector<8x16xf32> -> vector<8x16xf32>
    %45 = arith.truncf %44 : vector<8x16xf32> to vector<8x16xbf16>
    %46 = vector.extract_strided_slice %22 {offsets = [0, 0], sizes = [16, 32], strides = [1, 1]} : vector<32x32xf32> to vector<16x32xf32>
    %47 = arith.truncf %46 : vector<16x32xf32> to vector<16x32xbf16>
    %cst_26 = arith.constant dense<0.000000e+00> : vector<8x32xf32>
    %48 = tpu.matmul %45, %47, %cst_26 {dimension_numbers = #tpu.dot_dimension_numbers<[1], [0], [0], [1], [0, 0, 1, 1], [], []>} : vector<8x16xbf16>, vector<16x32xbf16>, vector<8x32xf32> -> vector<8x32xf32>
    %49 = arith.addf %23, %48 : vector<8x32xf32>
    %50 = vector.extract_strided_slice %13 {offsets = [0, 16], sizes = [8, 16], strides = [1, 1]} : vector<8x32xf32> to vector<8x16xf32>
    %51 = vector.extract_strided_slice %17 {offsets = [0, 16], sizes = [8, 16], strides = [1, 1]} : vector<8x32xf32> to vector<8x16xf32>
    %52 = vector.extract_strided_slice %21 {offsets = [0, 16], sizes = [8, 16], strides = [1, 1]} : vector<8x32xf32> to vector<8x16xf32>
    %53 = arith.truncf %50 : vector<8x16xf32> to vector<8x16xbf16>
    %54 = arith.truncf %51 : vector<8x16xf32> to vector<8x16xbf16>
    %cst_27 = arith.constant dense<0.000000e+00> : vector<8x8xf32>
    %55 = tpu.matmul %53, %54, %cst_27 {dimension_numbers = #tpu.dot_dimension_numbers<[1], [1], [0], [0], [0, 0, 1, 0], [], []>} : vector<8x16xbf16>, vector<8x16xbf16>, vector<8x8xf32> -> vector<8x8xf32>
    %cst_28 = arith.constant -1.000000e+09 : f32
    %56 = vector.broadcast %cst_28 : f32 to vector<8x8xf32>
    %57 = arith.select %7, %55, %56 : vector<8x8xi1>, vector<8x8xf32>
    %cst_29 = arith.constant dense<0xFF800000> : vector<8xf32>
    %58 = vector.multi_reduction <maximumf>, %57, %cst_29 [1] : vector<8x8xf32> to vector<8xf32>
    %59 = vector.shape_cast %58 : vector<8xf32> to vector<8x1xf32>
    %60 = vector.broadcast %59 : vector<8x1xf32> to vector<8x8xf32>
    %61 = arith.subf %57, %60 : vector<8x8xf32>
    %62 = math.exp %61 : vector<8x8xf32>
    %cst_30 = arith.constant dense<0.000000e+00> : vector<8xf32>
    %63 = vector.multi_reduction <add>, %62, %cst_30 [1] : vector<8x8xf32> to vector<8xf32>
    %64 = vector.shape_cast %63 : vector<8xf32> to vector<8x1xf32>
    %65 = tpu.reciprocal %64 {approx = true} : vector<8x1xf32> -> vector<8x1xf32>
    %66 = vector.broadcast %65 : vector<8x1xf32> to vector<8x8xf32>
    %67 = arith.mulf %62, %66 : vector<8x8xf32>
    %68 = arith.truncf %67 : vector<8x8xf32> to vector<8x8xbf16>
    %69 = arith.truncf %52 : vector<8x16xf32> to vector<8x16xbf16>
    %cst_31 = arith.constant dense<0.000000e+00> : vector<8x16xf32>
    %70 = tpu.matmul %68, %69, %cst_31 {dimension_numbers = #tpu.dot_dimension_numbers<[1], [0], [0], [1], [0, 0, 1, 1], [], []>} : vector<8x8xbf16>, vector<8x16xbf16>, vector<8x16xf32> -> vector<8x16xf32>
    %71 = arith.truncf %70 : vector<8x16xf32> to vector<8x16xbf16>
    %72 = vector.extract_strided_slice %22 {offsets = [16, 0], sizes = [16, 32], strides = [1, 1]} : vector<32x32xf32> to vector<16x32xf32>
    %73 = arith.truncf %72 : vector<16x32xf32> to vector<16x32xbf16>
    %cst_32 = arith.constant dense<0.000000e+00> : vector<8x32xf32>
    %74 = tpu.matmul %71, %73, %cst_32 {dimension_numbers = #tpu.dot_dimension_numbers<[1], [0], [0], [1], [0, 0, 1, 1], [], []>} : vector<8x16xbf16>, vector<16x32xbf16>, vector<8x32xf32> -> vector<8x32xf32>
    %75 = arith.addf %49, %74 : vector<8x32xf32>
    %76 = arith.addf %75, %1 : vector<8x32xf32>
    %cst_33 = arith.constant dense<0.000000e+00> : vector<8xf32>
    %77 = vector.multi_reduction <add>, %76, %cst_33 [1] : vector<8x32xf32> to vector<8xf32>
    %78 = vector.shape_cast %77 : vector<8xf32> to vector<8x1xf32>
    %cst_34 = arith.constant 3.200000e+01 : f32
    %79 = vector.broadcast %cst_34 : f32 to vector<8x1xf32>
    %80 = arith.divf %78, %79 : vector<8x1xf32>
    %81 = vector.broadcast %80 : vector<8x1xf32> to vector<8x32xf32>
    %82 = arith.subf %76, %81 : vector<8x32xf32>
    %83 = arith.mulf %82, %82 : vector<8x32xf32>
    %cst_35 = arith.constant dense<0.000000e+00> : vector<8xf32>
    %84 = vector.multi_reduction <add>, %83, %cst_35 [1] : vector<8x32xf32> to vector<8xf32>
    %85 = vector.shape_cast %84 : vector<8xf32> to vector<8x1xf32>
    %cst_36 = arith.constant 3.200000e+01 : f32
    %86 = vector.broadcast %cst_36 : f32 to vector<8x1xf32>
    %87 = arith.divf %85, %86 : vector<8x1xf32>
    %88 = vector.broadcast %80 : vector<8x1xf32> to vector<8x32xf32>
    %89 = arith.subf %76, %88 : vector<8x32xf32>
    %cst_37 = arith.constant 9.99999997E-7 : f32
    %90 = vector.broadcast %cst_37 : f32 to vector<8x1xf32>
    %91 = arith.addf %87, %90 : vector<8x1xf32>
    %92 = math.rsqrt %91 : vector<8x1xf32>
    %93 = vector.broadcast %92 : vector<8x1xf32> to vector<8x32xf32>
    %94 = arith.mulf %89, %93 : vector<8x32xf32>
    %c0_38 = arith.constant 0 : index
    %c0_39 = arith.constant 0 : index
    %95 = vector.load %arg8[%c0_38, %c0_39] : memref<1x32xf32, #tpu.memory_space<vmem>>, vector<1x32xf32>
    %96 = vector.broadcast %95 : vector<1x32xf32> to vector<8x32xf32>
    %97 = arith.mulf %94, %96 : vector<8x32xf32>
    %c0_40 = arith.constant 0 : index
    %c0_41 = arith.constant 0 : index
    %98 = vector.load %arg9[%c0_40, %c0_41] : memref<1x32xf32, #tpu.memory_space<vmem>>, vector<1x32xf32>
    %99 = vector.broadcast %98 : vector<1x32xf32> to vector<8x32xf32>
    %100 = arith.addf %97, %99 : vector<8x32xf32>
    %c0_42 = arith.constant 0 : index
    %c0_43 = arith.constant 0 : index
    %c0_44 = arith.constant 0 : index
    %101 = vector.load %arg10[%c0_42, %c0_43, %c0_44] : memref<1x8x32xf32, #tpu.memory_space<vmem>>, vector<1x8x32xf32>
    %102 = vector.shape_cast %101 : vector<1x8x32xf32> to vector<8x32xf32>
    %103 = vector.shape_cast %100 : vector<8x32xf32> to vector<1x8x32xf32>
    tpu.vector_store %arg10[%c0_42, %c0_43, %c0_44], %103 {strides = array<i32>} : memref<1x8x32xf32, #tpu.memory_space<vmem>>, vector<1x8x32xf32>,
    return
  }
  func.func @transform_0(%arg0: i32) -> (i32, i32, i32) {
    %c0_i32 = arith.constant 0 : i32
    %c0_i32_0 = arith.constant 0 : i32
    %c0_i32_1 = arith.constant 0 : i32
    return %arg0, %c0_i32, %c0_i32_0 : i32, i32, i32
  }
  func.func @transform_1(%arg0: i32) -> (i32, i32, i32) {
    %c0_i32 = arith.constant 0 : i32
    %c0_i32_0 = arith.constant 0 : i32
    %c0_i32_1 = arith.constant 0 : i32
    return %arg0, %c0_i32, %c0_i32_0 : i32, i32, i32
  }
  func.func @transform_2(%arg0: i32) -> (i32, i32, i32) {
    %c0_i32 = arith.constant 0 : i32
    %c0_i32_0 = arith.constant 0 : i32
    %c0_i32_1 = arith.constant 0 : i32
    return %arg0, %c0_i32, %c0_i32_0 : i32, i32, i32
  }
  func.func @transform_3(%arg0: i32) -> (i32, i32) {
    %c0_i32 = arith.constant 0 : i32
    %c0_i32_0 = arith.constant 0 : i32
    %c0_i32_1 = arith.constant 0 : i32
    return %c0_i32, %c0_i32_0 : i32, i32
  }
  func.func @transform_4(%arg0: i32) -> (i32, i32) {
    %c0_i32 = arith.constant 0 : i32
    %c0_i32_0 = arith.constant 0 : i32
    %c0_i32_1 = arith.constant 0 : i32
    return %c0_i32, %c0_i32_0 : i32, i32
  }
  func.func @transform_5(%arg0: i32) -> (i32, i32) {
    %c0_i32 = arith.constant 0 : i32
    %c0_i32_0 = arith.constant 0 : i32
    %c0_i32_1 = arith.constant 0 : i32
    return %c0_i32, %c0_i32_0 : i32, i32
  }
  func.func @transform_6(%arg0: i32) -> (i32, i32) {
    %c0_i32 = arith.constant 0 : i32
    %c0_i32_0 = arith.constant 0 : i32
    %c0_i32_1 = arith.constant 0 : i32
    return %c0_i32, %c0_i32_0 : i32, i32
  }
  func.func @transform_7(%arg0: i32) -> (i32, i32) {
    %c0_i32 = arith.constant 0 : i32
    %c0_i32_0 = arith.constant 0 : i32
    %c0_i32_1 = arith.constant 0 : i32
    return %c0_i32, %c0_i32_0 : i32, i32
  }
  func.func @transform_8(%arg0: i32) -> (i32, i32) {
    %c0_i32 = arith.constant 0 : i32
    %c0_i32_0 = arith.constant 0 : i32
    %c0_i32_1 = arith.constant 0 : i32
    return %c0_i32, %c0_i32_0 : i32, i32
  }
  func.func @transform_9(%arg0: i32) -> (i32, i32, i32) {
    %c0_i32 = arith.constant 0 : i32
    %c0_i32_0 = arith.constant 0 : i32
    %c0_i32_1 = arith.constant 0 : i32
    return %arg0, %c0_i32, %c0_i32_0 : i32, i32, i32
  }
}

module attributes {stable_mosaic.version = 11 : i64} {
  func.func @_ffn_kernel(%arg0: i32, %arg1: memref<16x32xf32, #tpu.memory_space<vmem>>, %arg2: memref<32x64xf32, #tpu.memory_space<vmem>>, %arg3: memref<1x64xf32, #tpu.memory_space<vmem>>, %arg4: memref<64x32xf32, #tpu.memory_space<vmem>>, %arg5: memref<1x32xf32, #tpu.memory_space<vmem>>, %arg6: memref<1x32xf32, #tpu.memory_space<vmem>>, %arg7: memref<1x32xf32, #tpu.memory_space<vmem>>, %arg8: memref<16x32xf32, #tpu.memory_space<vmem>>) attributes {dimension_semantics = [#tpu.dimension_semantics<parallel>], iteration_bounds = array<i64: 1>, scalar_prefetch = 0 : i64, scratch_operands = 0 : i64, tpu.core_type = #tpu.core_type<tc>, window_params = [{transform_indices = @transform_0, window_bounds = array<i64: 16, 32>}, {pipeline_mode = #tpu.pipeline_mode<synchronous>, transform_indices = @transform_1, window_bounds = array<i64: 32, 64>}, {pipeline_mode = #tpu.pipeline_mode<synchronous>, transform_indices = @transform_2, window_bounds = array<i64: 1, 64>}, {pipeline_mode = #tpu.pipeline_mode<synchronous>, transform_indices = @transform_3, window_bounds = array<i64: 64, 32>}, {pipeline_mode = #tpu.pipeline_mode<synchronous>, transform_indices = @transform_4, window_bounds = array<i64: 1, 32>}, {pipeline_mode = #tpu.pipeline_mode<synchronous>, transform_indices = @transform_5, window_bounds = array<i64: 1, 32>}, {pipeline_mode = #tpu.pipeline_mode<synchronous>, transform_indices = @transform_6, window_bounds = array<i64: 1, 32>}, {transform_indices = @transform_7, window_bounds = array<i64: 16, 32>}]} {
    %c0 = arith.constant 0 : index
    %c0_0 = arith.constant 0 : index
    %0 = vector.load %arg1[%c0, %c0_0] : memref<16x32xf32, #tpu.memory_space<vmem>>, vector<16x32xf32>
    %1 = arith.truncf %0 : vector<16x32xf32> to vector<16x32xbf16>
    %c0_1 = arith.constant 0 : index
    %c0_2 = arith.constant 0 : index
    %2 = vector.load %arg2[%c0_1, %c0_2] : memref<32x64xf32, #tpu.memory_space<vmem>>, vector<32x64xf32>
    %3 = arith.truncf %2 : vector<32x64xf32> to vector<32x64xbf16>
    %cst = arith.constant dense<0.000000e+00> : vector<16x64xf32>
    %4 = tpu.matmul %1, %3, %cst {dimension_numbers = #tpu.dot_dimension_numbers<[1], [0], [0], [1], [0, 0, 1, 1], [], []>} : vector<16x32xbf16>, vector<32x64xbf16>, vector<16x64xf32> -> vector<16x64xf32>
    %c0_3 = arith.constant 0 : index
    %c0_4 = arith.constant 0 : index
    %5 = vector.load %arg3[%c0_3, %c0_4] : memref<1x64xf32, #tpu.memory_space<vmem>>, vector<1x64xf32>
    %6 = vector.broadcast %5 : vector<1x64xf32> to vector<16x64xf32>
    %7 = arith.addf %4, %6 : vector<16x64xf32>
    %cst_5 = arith.constant 0.000000e+00 : f32
    %8 = vector.broadcast %cst_5 : f32 to vector<16x64xf32>
    %9 = arith.maximumf %7, %8 : vector<16x64xf32>
    %10 = arith.truncf %9 : vector<16x64xf32> to vector<16x64xbf16>
    %c0_6 = arith.constant 0 : index
    %c0_7 = arith.constant 0 : index
    %11 = vector.load %arg4[%c0_6, %c0_7] : memref<64x32xf32, #tpu.memory_space<vmem>>, vector<64x32xf32>
    %12 = arith.truncf %11 : vector<64x32xf32> to vector<64x32xbf16>
    %cst_8 = arith.constant dense<0.000000e+00> : vector<16x32xf32>
    %13 = tpu.matmul %10, %12, %cst_8 {dimension_numbers = #tpu.dot_dimension_numbers<[1], [0], [0], [1], [0, 0, 1, 1], [], []>} : vector<16x64xbf16>, vector<64x32xbf16>, vector<16x32xf32> -> vector<16x32xf32>
    %c0_9 = arith.constant 0 : index
    %c0_10 = arith.constant 0 : index
    %14 = vector.load %arg5[%c0_9, %c0_10] : memref<1x32xf32, #tpu.memory_space<vmem>>, vector<1x32xf32>
    %15 = vector.broadcast %14 : vector<1x32xf32> to vector<16x32xf32>
    %16 = arith.addf %13, %15 : vector<16x32xf32>
    %17 = arith.addf %16, %0 : vector<16x32xf32>
    %cst_11 = arith.constant dense<0.000000e+00> : vector<16xf32>
    %18 = vector.multi_reduction <add>, %17, %cst_11 [1] : vector<16x32xf32> to vector<16xf32>
    %19 = vector.shape_cast %18 : vector<16xf32> to vector<16x1xf32>
    %cst_12 = arith.constant 3.200000e+01 : f32
    %20 = vector.broadcast %cst_12 : f32 to vector<16x1xf32>
    %21 = arith.divf %19, %20 : vector<16x1xf32>
    %22 = vector.broadcast %21 : vector<16x1xf32> to vector<16x32xf32>
    %23 = arith.subf %17, %22 : vector<16x32xf32>
    %24 = arith.mulf %23, %23 : vector<16x32xf32>
    %cst_13 = arith.constant dense<0.000000e+00> : vector<16xf32>
    %25 = vector.multi_reduction <add>, %24, %cst_13 [1] : vector<16x32xf32> to vector<16xf32>
    %26 = vector.shape_cast %25 : vector<16xf32> to vector<16x1xf32>
    %cst_14 = arith.constant 3.200000e+01 : f32
    %27 = vector.broadcast %cst_14 : f32 to vector<16x1xf32>
    %28 = arith.divf %26, %27 : vector<16x1xf32>
    %29 = vector.broadcast %21 : vector<16x1xf32> to vector<16x32xf32>
    %30 = arith.subf %17, %29 : vector<16x32xf32>
    %cst_15 = arith.constant 9.99999997E-7 : f32
    %31 = vector.broadcast %cst_15 : f32 to vector<16x1xf32>
    %32 = arith.addf %28, %31 : vector<16x1xf32>
    %33 = math.rsqrt %32 : vector<16x1xf32>
    %34 = vector.broadcast %33 : vector<16x1xf32> to vector<16x32xf32>
    %35 = arith.mulf %30, %34 : vector<16x32xf32>
    %c0_16 = arith.constant 0 : index
    %c0_17 = arith.constant 0 : index
    %36 = vector.load %arg6[%c0_16, %c0_17] : memref<1x32xf32, #tpu.memory_space<vmem>>, vector<1x32xf32>
    %37 = vector.broadcast %36 : vector<1x32xf32> to vector<16x32xf32>
    %38 = arith.mulf %35, %37 : vector<16x32xf32>
    %c0_18 = arith.constant 0 : index
    %c0_19 = arith.constant 0 : index
    %39 = vector.load %arg7[%c0_18, %c0_19] : memref<1x32xf32, #tpu.memory_space<vmem>>, vector<1x32xf32>
    %40 = vector.broadcast %39 : vector<1x32xf32> to vector<16x32xf32>
    %41 = arith.addf %38, %40 : vector<16x32xf32>
    %c0_20 = arith.constant 0 : index
    %c0_21 = arith.constant 0 : index
    %42 = vector.load %arg8[%c0_20, %c0_21] : memref<16x32xf32, #tpu.memory_space<vmem>>, vector<16x32xf32>
    tpu.vector_store %arg8[%c0_20, %c0_21], %41 {strides = array<i32>} : memref<16x32xf32, #tpu.memory_space<vmem>>, vector<16x32xf32>,
    return
  }
  func.func @transform_0(%arg0: i32) -> (i32, i32) {
    %c0_i32 = arith.constant 0 : i32
    %c0_i32_0 = arith.constant 0 : i32
    return %arg0, %c0_i32 : i32, i32
  }
  func.func @transform_1(%arg0: i32) -> (i32, i32) {
    %c0_i32 = arith.constant 0 : i32
    %c0_i32_0 = arith.constant 0 : i32
    %c0_i32_1 = arith.constant 0 : i32
    return %c0_i32, %c0_i32_0 : i32, i32
  }
  func.func @transform_2(%arg0: i32) -> (i32, i32) {
    %c0_i32 = arith.constant 0 : i32
    %c0_i32_0 = arith.constant 0 : i32
    %c0_i32_1 = arith.constant 0 : i32
    return %c0_i32, %c0_i32_0 : i32, i32
  }
  func.func @transform_3(%arg0: i32) -> (i32, i32) {
    %c0_i32 = arith.constant 0 : i32
    %c0_i32_0 = arith.constant 0 : i32
    %c0_i32_1 = arith.constant 0 : i32
    return %c0_i32, %c0_i32_0 : i32, i32
  }
  func.func @transform_4(%arg0: i32) -> (i32, i32) {
    %c0_i32 = arith.constant 0 : i32
    %c0_i32_0 = arith.constant 0 : i32
    %c0_i32_1 = arith.constant 0 : i32
    return %c0_i32, %c0_i32_0 : i32, i32
  }
  func.func @transform_5(%arg0: i32) -> (i32, i32) {
    %c0_i32 = arith.constant 0 : i32
    %c0_i32_0 = arith.constant 0 : i32
    %c0_i32_1 = arith.constant 0 : i32
    return %c0_i32, %c0_i32_0 : i32, i32
  }
  func.func @transform_6(%arg0: i32) -> (i32, i32) {
    %c0_i32 = arith.constant 0 : i32
    %c0_i32_0 = arith.constant 0 : i32
    %c0_i32_1 = arith.constant 0 : i32
    return %c0_i32, %c0_i32_0 : i32, i32
  }
  func.func @transform_7(%arg0: i32) -> (i32, i32) {
    %c0_i32 = arith.constant 0 : i32
    %c0_i32_0 = arith.constant 0 : i32
    return %arg0, %c0_i32 : i32, i32
  }
}

module attributes {stable_mosaic.version = 11 : i64} {
  func.func @_layernorm_kernel(%arg0: i32, %arg1: memref<16x32xf32, #tpu.memory_space<vmem>>, %arg2: memref<1x32xf32, #tpu.memory_space<vmem>>, %arg3: memref<1x32xf32, #tpu.memory_space<vmem>>, %arg4: memref<16x32xf32, #tpu.memory_space<vmem>>) attributes {dimension_semantics = [#tpu.dimension_semantics<parallel>], iteration_bounds = array<i64: 1>, scalar_prefetch = 0 : i64, scratch_operands = 0 : i64, tpu.core_type = #tpu.core_type<tc>, window_params = [{transform_indices = @transform_0, window_bounds = array<i64: 16, 32>}, {pipeline_mode = #tpu.pipeline_mode<synchronous>, transform_indices = @transform_1, window_bounds = array<i64: 1, 32>}, {pipeline_mode = #tpu.pipeline_mode<synchronous>, transform_indices = @transform_2, window_bounds = array<i64: 1, 32>}, {transform_indices = @transform_3, window_bounds = array<i64: 16, 32>}]} {
    %c0 = arith.constant 0 : index
    %c0_0 = arith.constant 0 : index
    %0 = vector.load %arg1[%c0, %c0_0] : memref<16x32xf32, #tpu.memory_space<vmem>>, vector<16x32xf32>
    %cst = arith.constant dense<0.000000e+00> : vector<16xf32>
    %1 = vector.multi_reduction <add>, %0, %cst [1] : vector<16x32xf32> to vector<16xf32>
    %2 = vector.shape_cast %1 : vector<16xf32> to vector<16x1xf32>
    %cst_1 = arith.constant 3.200000e+01 : f32
    %3 = vector.broadcast %cst_1 : f32 to vector<16x1xf32>
    %4 = arith.divf %2, %3 : vector<16x1xf32>
    %5 = vector.broadcast %4 : vector<16x1xf32> to vector<16x32xf32>
    %6 = arith.subf %0, %5 : vector<16x32xf32>
    %7 = arith.mulf %6, %6 : vector<16x32xf32>
    %cst_2 = arith.constant dense<0.000000e+00> : vector<16xf32>
    %8 = vector.multi_reduction <add>, %7, %cst_2 [1] : vector<16x32xf32> to vector<16xf32>
    %9 = vector.shape_cast %8 : vector<16xf32> to vector<16x1xf32>
    %cst_3 = arith.constant 3.200000e+01 : f32
    %10 = vector.broadcast %cst_3 : f32 to vector<16x1xf32>
    %11 = arith.divf %9, %10 : vector<16x1xf32>
    %12 = vector.broadcast %4 : vector<16x1xf32> to vector<16x32xf32>
    %13 = arith.subf %0, %12 : vector<16x32xf32>
    %cst_4 = arith.constant 9.99999997E-7 : f32
    %14 = vector.broadcast %cst_4 : f32 to vector<16x1xf32>
    %15 = arith.addf %11, %14 : vector<16x1xf32>
    %16 = math.rsqrt %15 : vector<16x1xf32>
    %17 = vector.broadcast %16 : vector<16x1xf32> to vector<16x32xf32>
    %18 = arith.mulf %13, %17 : vector<16x32xf32>
    %c0_5 = arith.constant 0 : index
    %c0_6 = arith.constant 0 : index
    %19 = vector.load %arg2[%c0_5, %c0_6] : memref<1x32xf32, #tpu.memory_space<vmem>>, vector<1x32xf32>
    %20 = vector.broadcast %19 : vector<1x32xf32> to vector<16x32xf32>
    %21 = arith.mulf %18, %20 : vector<16x32xf32>
    %c0_7 = arith.constant 0 : index
    %c0_8 = arith.constant 0 : index
    %22 = vector.load %arg3[%c0_7, %c0_8] : memref<1x32xf32, #tpu.memory_space<vmem>>, vector<1x32xf32>
    %23 = vector.broadcast %22 : vector<1x32xf32> to vector<16x32xf32>
    %24 = arith.addf %21, %23 : vector<16x32xf32>
    %c0_9 = arith.constant 0 : index
    %c0_10 = arith.constant 0 : index
    %25 = vector.load %arg4[%c0_9, %c0_10] : memref<16x32xf32, #tpu.memory_space<vmem>>, vector<16x32xf32>
    tpu.vector_store %arg4[%c0_9, %c0_10], %24 {strides = array<i32>} : memref<16x32xf32, #tpu.memory_space<vmem>>, vector<16x32xf32>,
    return
  }
  func.func @transform_0(%arg0: i32) -> (i32, i32) {
    %c0_i32 = arith.constant 0 : i32
    %c0_i32_0 = arith.constant 0 : i32
    return %arg0, %c0_i32 : i32, i32
  }
  func.func @transform_1(%arg0: i32) -> (i32, i32) {
    %c0_i32 = arith.constant 0 : i32
    %c0_i32_0 = arith.constant 0 : i32
    %c0_i32_1 = arith.constant 0 : i32
    return %c0_i32, %c0_i32_0 : i32, i32
  }
  func.func @transform_2(%arg0: i32) -> (i32, i32) {
    %c0_i32 = arith.constant 0 : i32
    %c0_i32_0 = arith.constant 0 : i32
    %c0_i32_1 = arith.constant 0 : i32
    return %c0_i32, %c0_i32_0 : i32, i32
  }
  func.func @transform_3(%arg0: i32) -> (i32, i32) {
    %c0_i32 = arith.constant 0 : i32
    %c0_i32_0 = arith.constant 0 : i32
    return %arg0, %c0_i32 : i32, i32
  }
}

</mosaic_0001>

<bundles_post_ra>
// kernel: decoder_forward.8
= control target key start
LH: loop header
LB: loop body
LE: loop exit
PB: predicated region body
PF: predicated region fallthrough
CT: control target
= control target key end

     0   :  { %s218_s9 = smov 0   ;;  %s246_s0 = inlined_call_operand.vmem [shape: f32[2,8,32], index: 0, kind: input, shape index: {}]   ;;  %s247_s1 = inlined_call_operand.vmem [shape: f32[1,8,32], index: 1, kind: input, shape index: {}]   ;;  %s248_s2 = inlined_call_operand.vmem [shape: f32[2,8,32], index: 2, kind: output, shape index: {}]  }
   0x1 LB: > { %s197_s10 = sadd.s32 4294967295, %s220_s9   ;;  %p201_p0 = scmp.ge.s32.totalorder %s220_s9, 1  ;;  %s220_s9 = sphi %s218_s9, %s12_s9  }
   0x2   : > { %p111_p1 = scmp.lt.s32.totalorder %s220_s9, 3 }
   0x4   : > { %p112_p2 = pnand %p201_p0, %p111_p1 }
   0x5   : > { %p131_p3 = scmp.lt.s32.totalorder (!%p112_p2), %s197_s10, 1  ;;  %v140_v0 = vld [vmem:[%s247_s1] sm:$0xff] (!%p112_p2)  ;;  %vm142_vm0 = vcmask (!%p112_p2), 261120  }
   0x6   : > { %115 = sbr.rel (%p112_p2) target bundleno = 20 (0x14), region = 28 }
   0xd   : > { %s250_s10 = smov (!%p131_p3, %s197_s10), 1 }
   0xe   : > { %s202_s11 = sshll.u32 %s250_s10, 3 }
   0xf   : > { %s134_s16 = scalar_lea.vmem %s246_s0, %s202_s11  ;;  %s138_s19 = scalar_lea.vmem %s248_s2, %s202_s11 }
  0x10   : > { %v139_v1 = vld [vmem:[%s134_s16] sm:$0xff] }
  0x11   : > { %v141_v2 = vadd.f32 %v140_v0, %v139_v1 }
  0x13   : > { %143 = vst.msk [vmem:[%s138_s19] sm:$0xff] %vm142_vm0, %v141_v2 }
  0x14 PF: > { %s12_s9 = sadd.s32 1, %s220_s9  }
  0x15   : > { %p9_p4 = scmp.ge.s32.totalorder %s12_s9, 4  }
  0x17   :  { %11 = sbr.rel (!%p9_p4) target bundleno = 1 (0x1), region = 58 }

// kernel: decoder_forward.15
= control target key start
LH: loop header
LB: loop body
LE: loop exit
PB: predicated region body
PF: predicated region fallthrough
CT: control target
= control target key end

     0   :  { %vm17_vm0 = vcmask 261120   ;;  %s167_s0 = inlined_call_operand.vmem [shape: f32[16,32], index: 0, kind: input, shape index: {}]   ;;  %s168_s1 = inlined_call_operand.vmem [shape: f32[1,32], index: 1, kind: input, shape index: {}]   ;;  %s169_s2 = inlined_call_operand.vmem [shape: f32[1,32], index: 2, kind: input, shape index: {}]   ;;  %s170_s3 = inlined_call_operand.hbm [shape: f32[16,32], index: 3, kind: output, shape index: {}]  }
   0x1   :  { %v15_v0 = vld [vmem:[%s167_s0] sm:$0xff]  ;;  %v16_v1 = vld [vmem:[%s167_s0 + $0x8] sm:$0xff] }
   0x2   :  { %8 = vsyncpa [#allocation3], 0  ;;  %v18_v2 = vsel %vm17_vm0, %v15_v0, 0.0  ;;  %v21_v3 = vsel %vm17_vm0, %v16_v1, 0.0  ;;  %v81_v21 = vld [vmem:[%s168_s1] ss:$0 sm:$0xff] }
   0x3   :  { %19 = vadd.xlane.f32.xlu0 %v18_v2  ;;  %v82_v23 = vld [vmem:[%s169_s2] ss:$0 sm:$0xff]  ;;  %s114_s19 = smov [#allocation2]  }
   0x4   :  { %s70_s20 = sshll.u32 %s114_s19, 4  ;;  %s71_s20 = int_to_ptr.vmem [resolvable:$true] %s70_s20 }
   0x5   :  { %s90_s21 = scalar_lea.vmem %s71_s20, 256  ;;  %p95_p1 = scmp.lt.s32.totalorder %s71_s20, %s71_s20 }
   0x6   :  { %p91_p0 = scmp.ne.s32.totalorder %s71_s20, %s90_s21  ;;  %p96_p2 = scmp.lt.s32.totalorder %s90_s21, %s90_s21 }
   0x7   :  { %22 = vadd.xlane.f32.xlu0 %v21_v3 }
   0x8   :  { %p97_p3 = por %p96_p2, %p95_p1 }
   0xa   :  { %p98_p4 = pnand %p97_p3, %p91_p0 }
  0x90   :  { %v20_v4 = vpop.xlane.xlu0 %19 }
  0x91   :  { %v25_v5 = vmul.f32 0.03125, %v20_v4 }
  0x93   :  { %v27_v6 = vsub.f32 %v15_v0, %v25_v5 }
  0x94   :  { %v23_v7 = vpop.xlane.xlu0 %22 }
  0x95   :  { %v26_v8 = vmul.f32 0.03125, %v23_v7  ;;  %v29_v9 = vmul.f32 %v27_v6, %v27_v6 }
  0x97   :  { %v28_v10 = vsub.f32 %v16_v1, %v26_v8  ;;  %v31_v11 = vsel %vm17_vm0, %v29_v9, 0.0 }
  0x98   :  { %32 = vadd.xlane.f32.xlu1 %v31_v11 }
  0x99   :  { %v30_v12 = vmul.f32 %v28_v10, %v28_v10 }
  0x9b   :  { %v34_v13 = vsel %vm17_vm0, %v30_v12, 0.0 }
  0x9c   :  { %35 = vadd.xlane.f32.xlu1 %v34_v13 }
 0x125   :  { %v33_v14 = vpop.xlane.xlu1 %32 }
 0x126   :  { %v37_v15 = vmul.f32 0.03125, %v33_v14 }
 0x128   :  { %v39_v16 = vadd.f32 1e-06, %v37_v15 }
 0x129   :  { %v36_v17 = vpop.xlane.xlu1 %35 }
 0x12a   :  { %86 = vrsqrt.f32 %v39_v16  ;;  %v38_v18 = vmul.f32 0.03125, %v36_v17 }
 0x12c   :  { %v40_v19 = vadd.f32 1e-06, %v38_v18 }
 0x12e   :  { %88 = vrsqrt.f32 %v40_v19 }
 0x134   :  { %v87_v20 = vpop.eup %86 }
 0x135   :  { %v43_v22 = vmul.f32 %v87_v20, %v27_v6 }
 0x137   :  { %v52_v24 = vmul.f32 %v81_v21, %v43_v22 }
 0x138   :  { %v89_v25 = vpop.eup %88 }
 0x139   :  { %v44_v26 = vmul.f32 %v89_v25, %v28_v10  ;;  %v61_v27 = vadd.f32 %v82_v23, %v52_v24 }
 0x13b   :  { %v53_v28 = vmul.f32 %v81_v21, %v44_v26  ;;  %63 = vst.msk [vmem:[#allocation2] sm:$0xff] %vm17_vm0, %v61_v27 }
 0x13d   :  { %v62_v29 = vadd.f32 %v82_v23, %v53_v28 }
 0x13f   :  { %64 = vst.msk [vmem:[#allocation2 + $0x8] sm:$0xff] %vm17_vm0, %v62_v29 }
 0x140   :  { %101 = shalt.err (!%p98_p4)
}
 0x141   :  { %s102_s22 = scalar_lea.hbm %s170_s3, 256 }
 0x142   :  { %p103_p5 = scmp.ne.s32.totalorder %s170_s3, %s102_s22  ;;  %p106_p6 = scmp.lt.u32.totalorder %s102_s22, %s170_s3 }
 0x144   :  { %p108_p7 = pnand %p106_p6, %p103_p5 }
 0x146   :  { %111 = shalt.err (!%p108_p7)
}
 0x147   :  { %s115_s27 = smov 128   ;;  %s116_s28 = smov 8  }
 0x148   :  { %76 = dma.vmem_to_hbm [thread:$0]  %s71_s20, 256, %s170_s3, [#allocation3], %s115_s27, %s115_s27, %s116_s28  }
 0x149   :  { %112 = dma.done.wait [#allocation3], 256  }
 0x14a   :  { %113 = vsyncadd [#allocation3], 4294967040 }
 0x14b   :  { %80 = vsyncpa [#allocation3], 1 }

// kernel: decoder_forward.11
= control target key start
LH: loop header
LB: loop body
LE: loop exit
PB: predicated region body
PF: predicated region fallthrough
CT: control target
= control target key end

     0   :  { %v248_v0 = vmov 0.0   ;;  %vm249_vm0 = vmmov 0   ;;  %vm43_vm1 = vcmask 261120   ;;  %vm110_vm2 = vcmask 523264   ;;  %s357_s1 = inlined_call_operand.vmem [shape: f32[32,64], index: 1, kind: input, shape index: {}]   ;;  %s358_s3 = inlined_call_operand.vmem [shape: f32[64,32], index: 3, kind: input, shape index: {}]   ;;  %s359_s0 = inlined_call_operand.vmem [shape: f32[16,32], index: 0, kind: input, shape index: {}]   ;;  %s360_s2 = inlined_call_operand.vmem [shape: f32[1,64], index: 2, kind: input, shape index: {}]   ;;  %s361_s4 = inlined_call_operand.vmem [shape: f32[1,32], index: 4, kind: input, shape index: {}]   ;;  %s362_s5 = inlined_call_operand.vmem [shape: f32[1,32], index: 5, kind: input, shape index: {}]   ;;  %s363_s6 = inlined_call_operand.vmem [shape: f32[1,32], index: 6, kind: input, shape index: {}]   ;;  %s364_s7 = inlined_call_operand.vmem [shape: f32[16,32], index: 7, kind: output, shape index: {}]  }
   0x1   :  { %222 = vmatprep.subr.bf16.mxu0 %v248_v0  ;;  %v30_v1 = vld [vmem:[%s357_s1] sm:$0xff]  ;;  %v31_v2 = vld [vmem:[%s357_s1 + $0x8] sm:$0xff]  ;;  %v32_v3 = vld [vmem:[%s357_s1 + $0x10] sm:$0xff]  ;;  %226 = vmatprep.mubr.msk.bf16.mxu0 %vm249_vm0, %v248_v0 }
   0x2   :  { %v34_v4 = vpack.c.bf16 %v31_v2, %v30_v1  ;;  %v33_v5 = vld [vmem:[%s357_s1 + $0x18] sm:$0xff]  ;;  %230 = vmatprep.subr.bf16.mxu1 %v248_v0  ;;  %238 = vmatprep.mubr.msk.bf16.mxu1 %vm249_vm0, %v248_v0  ;;  %v91_v6 = vld [vmem:[%s358_s3] sm:$0xff]  ;;  %v92_v7 = vld [vmem:[%s358_s3 + $0x8] sm:$0xff] }
   0x3   :  { %v93_v8 = vld [vmem:[%s358_s3 + $0x10] sm:$0xff]  ;;  %v35_v9 = vpack.c.bf16 %v33_v5, %v32_v3  ;;  %v27_v10 = vld [vmem:[%s359_s0] sm:$0xff]  ;;  %v28_v11 = vld [vmem:[%s359_s0 + $0x8] sm:$0xff]  ;;  %v99_v12 = vpack.c.bf16 %v92_v7, %v91_v6 }
   0x4   :  { %223 = vmatpush3.bf16.msra.mxu0 %v34_v4  ;;  %v94_v13 = vld [vmem:[%s358_s3 + $0x18] sm:$0xff]  ;;  %v29_v15 = vpack.c.bf16 %v28_v11, %v27_v10  ;;  %v95_v16 = vld [vmem:[%s358_s3 + $0x20] sm:$0xff]  ;;  %v96_v17 = vld [vmem:[%s358_s3 + $0x28] sm:$0xff] }
   0x5   :  { %224 = vmatprep.subr.bf16.mxu0 %v248_v0  ;;  %231 = vmatpush3.bf16.msra.mxu1 %v99_v12  ;;  %v100_v14 = vpack.c.bf16 %v94_v13, %v93_v8  ;;  %v101_v18 = vpack.c.bf16 %v96_v17, %v95_v16  ;;  %v97_v19 = vld [vmem:[%s358_s3 + $0x30] sm:$0xff]  ;;  %v98_v20 = vld [vmem:[%s358_s3 + $0x38] sm:$0xff]  ;;  %v208_v22 = vld [vmem:[%s360_s2] ss:$0 sm:$0xff] }
   0x6   :  { %232 = vmatprep.subr.bf16.mxu1 %v248_v0  ;;  %v102_v21 = vpack.c.bf16 %v98_v20, %v97_v19  ;;  %v210_v32 = vld [vmem:[%s361_s4] ss:$0 sm:$0xff] }
   0x7   :  { %v212_v60 = vld [vmem:[%s362_s5] ss:$0 sm:$0xff] }
   0x8   :  { %225 = vmatpush3.bf16.msra.mxu0 %v35_v9  ;;  %v213_v62 = vld [vmem:[%s363_s6] ss:$0 sm:$0xff] }
   0x9   :  { %233 = vmatpush3.bf16.msra.mxu1 %v100_v14 }
   0xa   :  { %234 = vmatprep.subr.bf16.mxu1 %v248_v0 }
   0xb   :  { %227 = vmatmul.mubr.msk.bf16.vlgmr.msra.gmra.mrb[0].mxu0 %vm43_vm1, %v29_v15 }
   0xd   :  { %235 = vmatpush3.bf16.msra.mxu1 %v101_v18 }
   0xe   :  { %236 = vmatprep.subr.bf16.mxu1 %v248_v0 }
  0x11   :  { %237 = vmatpush3.bf16.msra.mxu1 %v102_v21 }
  0xde   :  { %v81_v23 = vpop.f32.mrb[0].mxu0 }
  0xdf   :  { %v82_v24 = vadd.f32 %v208_v22, %v81_v23  ;;  %v228_v25 = vpop.f32.mrb[1].mxu0 }
  0xe0   :  { %v84_v26 = vpop.f32.mrb[2].mxu0 }
  0xe1   :  { %v85_v27 = vadd.f32 %v208_v22, %v84_v26  ;;  %v229_v28 = vpop.f32.mrb[3].mxu0  ;;  %v88_v29 = vmax.f32 %v82_v24, 0.0 }
  0xe3   :  { %v89_v30 = vmax.f32 %v85_v27, 0.0 }
  0xe5   :  { %v90_v31 = vpack.c.bf16 %v89_v30, %v88_v29 }
  0xe7   :  { %239 = vmatmul.mubr.msk.bf16.vlgmr.msra.gmra.mrb[0].mxu1 %vm110_vm2, %v90_v31 }
 0x1ba   :  { %v148_v33 = vpop.f32.mrb[0].mxu1 }
 0x1bb   :  { %v149_v34 = vadd.f32 %v210_v32, %v148_v33  ;;  %v240_v35 = vpop.f32.mrb[1].mxu1 }
 0x1bc   :  { %v151_v36 = vpop.f32.mrb[2].mxu1 }
 0x1bd   :  { %v152_v37 = vadd.f32 %v210_v32, %v151_v36  ;;  %v241_v38 = vpop.f32.mrb[3].mxu1  ;;  %v155_v39 = vadd.f32 %v149_v34, %v27_v10 }
 0x1bf   :  { %v157_v40 = vsel %vm43_vm1, %v155_v39, 0.0  ;;  %v156_v41 = vadd.f32 %v152_v37, %v28_v11 }
 0x1c0   :  { %158 = vadd.xlane.f32.xlu0 %v157_v40 }
 0x1c1   :  { %v160_v42 = vsel %vm43_vm1, %v156_v41, 0.0 }
 0x1c4   :  { %161 = vadd.xlane.f32.xlu0 %v160_v42 }
 0x24d   :  { %v159_v43 = vpop.xlane.xlu0 %158 }
 0x24e   :  { %v164_v44 = vmul.f32 0.03125, %v159_v43 }
 0x250   :  { %v166_v45 = vsub.f32 %v155_v39, %v164_v44 }
 0x251   :  { %v162_v46 = vpop.xlane.xlu0 %161 }
 0x252   :  { %v165_v47 = vmul.f32 0.03125, %v162_v46  ;;  %v168_v48 = vmul.f32 %v166_v45, %v166_v45 }
 0x254   :  { %v167_v49 = vsub.f32 %v156_v41, %v165_v47  ;;  %v170_v50 = vsel %vm43_vm1, %v168_v48, 0.0 }
 0x255   :  { %171 = vadd.xlane.f32.xlu1 %v170_v50 }
 0x256   :  { %v169_v51 = vmul.f32 %v167_v49, %v167_v49 }
 0x258   :  { %v173_v52 = vsel %vm43_vm1, %v169_v51, 0.0 }
 0x259   :  { %174 = vadd.xlane.f32.xlu1 %v173_v52 }
 0x2e2   :  { %v172_v53 = vpop.xlane.xlu1 %171 }
 0x2e3   :  { %v176_v54 = vmul.f32 0.03125, %v172_v53 }
 0x2e5   :  { %v178_v55 = vadd.f32 1e-06, %v176_v54 }
 0x2e6   :  { %v175_v56 = vpop.xlane.xlu1 %174 }
 0x2e7   :  { %244 = vrsqrt.f32 %v178_v55  ;;  %v177_v57 = vmul.f32 0.03125, %v175_v56 }
 0x2e9   :  { %v179_v58 = vadd.f32 1e-06, %v177_v57 }
 0x2eb   :  { %246 = vrsqrt.f32 %v179_v58 }
 0x2f1   :  { %v245_v59 = vpop.eup %244 }
 0x2f2   :  { %v182_v61 = vmul.f32 %v245_v59, %v166_v45 }
 0x2f4   :  { %v191_v63 = vmul.f32 %v212_v60, %v182_v61 }
 0x2f5   :  { %v247_v0 = vpop.eup %246 }
 0x2f6   :  { %v200_v1 = vadd.f32 %v213_v62, %v191_v63  ;;  %v183_v2 = vmul.f32 %v247_v0, %v167_v49 }
 0x2f8   :  { %202 = vst.msk [vmem:[%s364_s7] sm:$0xff] %vm43_vm1, %v200_v1  ;;  %v192_v3 = vmul.f32 %v212_v60, %v183_v2 }
 0x2fa   :  { %v201_v4 = vadd.f32 %v213_v62, %v192_v3 }
 0x2fc   :  { %203 = vst.msk [vmem:[%s364_s7 + $0x8] sm:$0xff] %vm43_vm1, %v201_v4 }

// kernel: decoder_forward.9
= control target key start
LH: loop header
LB: loop body
LE: loop exit
PB: predicated region body
PF: predicated region fallthrough
CT: control target
= control target key end

     0   :  { %s1128_s30 = smov 0   ;;  %s1269_s0 = inlined_call_operand.vmem [shape: f32[2,8,32], index: 0, kind: input, shape index: {}, may-alias: {0,1}]   ;;  %s1270_s1 = inlined_call_operand.vmem [shape: f32[2,8,32], index: 1, kind: input, shape index: {}, may-alias: {0,1}]   ;;  %s1271_s2 = inlined_call_operand.vmem [shape: f32[2,8,8], index: 2, kind: input, shape index: {}]   ;;  %s1272_s3 = inlined_call_operand.vmem [shape: f32[32,32], index: 3, kind: input, shape index: {}]   ;;  %s1273_s4 = inlined_call_operand.vmem [shape: f32[32,32], index: 4, kind: input, shape index: {}]   ;;  %s1274_s5 = inlined_call_operand.vmem [shape: f32[32,32], index: 5, kind: input, shape index: {}]   ;;  %s1275_s6 = inlined_call_operand.vmem [shape: f32[32,32], index: 6, kind: input, shape index: {}]   ;;  %s1276_s7 = inlined_call_operand.vmem [shape: f32[1,32], index: 7, kind: input, shape index: {}]   ;;  %s1277_s8 = inlined_call_operand.vmem [shape: f32[1,32], index: 8, kind: input, shape index: {}]   ;;  %s1278_s9 = inlined_call_operand.vmem [shape: f32[2,8,32], index: 9, kind: output, shape index: {}]  }
   0x1 LB: > { %s943_s10 = sadd.s32 4294967295, %s1073_s30   ;;  %p947_p0 = scmp.ge.s32.totalorder %s1073_s30, 1  ;;  %s1073_s30 = sphi %s1128_s30, %s19_s30  }
   0x2   : > { %p304_p1 = scmp.lt.s32.totalorder %s1073_s30, 3 }
   0x4   : > { %p305_p2 = pnand %p947_p0, %p304_p1 }
   0x5   : > { %v420_v0 = vld [vmem:[%s1273_s4] sm:$0xff] (!%p305_p2)  ;;  %v421_v1 = vld [vmem:[%s1273_s4 + $0x8] sm:$0xff] (!%p305_p2)  ;;  %p346_p3 = scmp.lt.s32.totalorder (!%p305_p2), %s943_s10, 1  ;;  %v1075_v3 = vmov (!%p305_p2), 0.0   ;;  %v422_v6 = vld [vmem:[%s1273_s4 + $0x10] sm:$0xff] (!%p305_p2)  ;;  %vm1076_vm0 = vmmov (!%p305_p2), 0  }
   0x6   : > { %308 = sbr.rel (%p305_p2) target bundleno = 1629 (0x65d), region = 56  ;;  %v368_v2 = vld [vmem:[%s1272_s3] sm:$0xff] (!%p305_p2)  ;;  %994 = vmatprep.subr.bf16.mxu1 (!%p305_p2), %v1075_v3  ;;  %v424_v4 = vpack.c.bf16 (!%p305_p2), %v421_v1, %v420_v0  ;;  %986 = vmatprep.subr.bf16.mxu0 (!%p305_p2), %v1075_v3  ;;  %v369_v5 = vld [vmem:[%s1272_s3 + $0x8] sm:$0xff] (!%p305_p2)  ;;  %v423_v7 = vld [vmem:[%s1273_s4 + $0x18] sm:$0xff] (!%p305_p2)  ;;  %vm374_vm1 = vcmask (!%p305_p2), 261120   ;;  %vm521_vm2 = vcmask (!%p305_p2), 130048  }
   0x7   : > { %v372_v8 = vpack.c.bf16 (!%p305_p2), %v369_v5, %v368_v2  ;;  %998 = vmatprep.mubr.msk.bf16.mxu1 (!%p305_p2), %vm1076_vm0, %v1075_v3  ;;  %v370_v9 = vld [vmem:[%s1272_s3 + $0x10] sm:$0xff] (!%p305_p2)  ;;  %v371_v10 = vld [vmem:[%s1272_s3 + $0x18] sm:$0xff] (!%p305_p2)  ;;  %990 = vmatprep.mubr.msk.bf16.mxu0 (!%p305_p2), %vm1076_vm0, %v1075_v3  ;;  %v425_v11 = vpack.c.bf16 (!%p305_p2), %v423_v7, %v422_v6  ;;  %v469_v29 = vld [vmem:[%s1274_s5] sm:$0xff] (!%p305_p2)  ;;  %vm569_vm4 = vcmask (!%p305_p2), 64512   ;;  %vm586_vm5 = vcmask (!%p305_p2), 1043456  }
   0x8   : > { %995 = vmatpush3.bf16.msra.mxu1 (!%p305_p2), %v424_v4  ;;  %v373_v12 = vpack.c.bf16 (!%p305_p2), %v371_v10, %v370_v9  ;;  %v470_v30 = vld [vmem:[%s1274_s5 + $0x8] sm:$0xff] (!%p305_p2)  ;;  %v471_v31 = vld [vmem:[%s1274_s5 + $0x10] sm:$0xff] (!%p305_p2)  ;;  %v472_v33 = vld [vmem:[%s1274_s5 + $0x18] sm:$0xff] (!%p305_p2) }
   0x9   : > { %996 = vmatprep.subr.bf16.mxu1 (!%p305_p2), %v1075_v3  ;;  %987 = vmatpush3.bf16.msra.mxu0 (!%p305_p2), %v372_v8  ;;  %v473_v32 = vpack.c.bf16 (!%p305_p2), %v470_v30, %v469_v29  ;;  %v474_v34 = vpack.c.bf16 (!%p305_p2), %v472_v33, %v471_v31  ;;  %v517_v8 = vld [vmem:[%s1275_s6 + $0x10] sm:$0xff] (!%p305_p2)  ;;  %v518_v9 = vld [vmem:[%s1275_s6 + $0x18] sm:$0xff] (!%p305_p2) }
   0xa   : > { %988 = vmatprep.subr.bf16.mxu0 (!%p305_p2), %v1075_v3  ;;  %v747_v10 = vpack.c.bf16 (!%p305_p2), %v518_v9, %v517_v8 }
   0xc   : > { %997 = vmatpush3.bf16.msra.mxu1 (!%p305_p2), %v425_v11 }
   0xd   : > { %s1280_s10 = smov (!%p346_p3, %s943_s10), 1  ;;  %989 = vmatpush3.bf16.msra.mxu0 %v373_v12  ;;  %1010 = vmatprep.subr.bf16.mxu1 %v1075_v3 }
   0xe   : > { %s1167_s27 = sshll.u32 %s1280_s10, 3  ;;  %1002 = vmatprep.subr.bf16.mxu0 %v1075_v3  ;;  %s1077_s10 = smov 112  }
   0xf   : > { %s353_s11 = scalar_lea.vmem %s1270_s1, %s1167_s27  ;;  %s349_s14 = scalar_lea.vmem %s1269_s0, %s1167_s27 }
  0x10   : > { %v364_v13 = vld [vmem:[%s353_s11] sm:$0xff]  ;;  %s357_s25 = scalar_lea.vmem %s1271_s2, %s1167_s27  ;;  %s361_s21 = scalar_lea.vmem %s1278_s9, %s1167_s27 }
  0x11   : > { %v419_v14 = vpack.c.bf16 %v364_v13, %v364_v13  ;;  %v1178_v15 = vld [vmem:[%s349_s14] sm:$0xff] }
  0x12   : > { %v367_v16 = vpack.c.bf16 %v1178_v15, %v1178_v15  ;;  %v365_v38 = vld [vmem:[%s357_s25] sm:$0xff] }
  0x13   : > { %999 = vmatmul.mubr.msk.bf16.vlgmr.msra.gmra.mrb[0].mxu1 %vm374_vm1, %v419_v14  ;;  %vm366_vm3 = vcmp.ne.f32.partialorder %v365_v38, 0.0 }
  0x14   : > { %991 = vmatmul.mubr.msk.bf16.vlgmr.msra.gmra.mrb[0].mxu0 %vm374_vm1, %v367_v16  ;;  %1012 = vmatprep.mubr.msk.bf16.mxu1 %vm1076_vm0, %v1075_v3  ;;  %v516_v16 = vld [vmem:[%s1275_s6 + $0x8] sm:$0xff] }
  0x15   : > { %1006 = vmatprep.mubr.msk.bf16.mxu0 %vm1076_vm0, %v1075_v3  ;;  %1003 = vmatpush3.bf16.msra.mxu0 %v473_v32 }
  0x16   : > { %1004 = vmatprep.subr.bf16.mxu0 %v1075_v3 }
  0x19   : > { %1005 = vmatpush3.bf16.msra.mxu0 %v474_v34 }
  0x1a   : > { %1016 = vmatprep.subr.bf16.mxu0 %v1075_v3 }
  0x1c   : > { %1007 = vmatmul.mubr.msk.bf16.vlgmr.msra.gmra.mrb[4].mxu0 %vm374_vm1, %v419_v14  ;;  %v515_v14 = vld [vmem:[%s1275_s6] sm:$0xff] }
  0x1d   : > { %1018 = vmatprep.mubr.msk.bf16.mxu0 %vm1076_vm0, %v1075_v3 }
  0xe6   : > { %v463_v17 = vpop.f32.mrb[0].mxu1 }
  0xe7   : > { %v520_v18 = vpack.c.bf16 %v463_v17, %v463_v17  ;;  %v1000_v19 = vpop.f32.mrb[1].mxu1  ;;  %v412_v20 = vpop.f32.mrb[0].mxu0 }
  0xe8   : > { %v466_v21 = vpop.f32.mrb[2].mxu1  ;;  %v418_v22 = vmul.f32 0.25, %v412_v20  ;;  %v992_v23 = vpop.f32.mrb[1].mxu0  ;;  %v631_v19 = vpack.c.bf16 %v516_v16, %v515_v14 }
  0xe9   : > { %v526_v24 = vsel %vm521_vm2, %v520_v18, 0  ;;  %636 = vrot.lane.b32.xlu0 %v520_v18, %s1077_s10  ;;  %v1001_v25 = vpop.f32.mrb[3].mxu1  ;;  %v415_v26 = vpop.f32.mrb[2].mxu0 }
  0xea   : > { %v519_v27 = vpack.c.bf16 %v418_v22, %v418_v22  ;;  %1011 = vmatpush3.bf16.xpose.msra.mxu1 %v526_v24  ;;  %v993_v28 = vpop.f32.mrb[3].mxu0 }
  0xeb   : > { %1022 = vmatprep.subr.bf16.mxu1 %v1075_v3 }
  0xed   : > { %633 = vrot.lane.b32.xlu0 %v519_v27, %s1077_s10 }
  0xef   : > { %v509_v56 = vpop.f32.mrb[4].mxu0 }
  0xf0   : > { %v1008_v57 = vpop.f32.mrb[5].mxu0  ;;  %v582_v60 = vpack.c.bf16 %v509_v56, %v509_v56 }
  0xf1   : > { %1013 = vmatmul.mubr.msk.bf16.vlgmr.msra.gmra.mrb[4].mxu1 %vm521_vm2, %v519_v27  ;;  %v512_v58 = vpop.f32.mrb[6].mxu0 }
  0xf2   : > { %1024 = vmatprep.mubr.msk.bf16.mxu1 %vm1076_vm0, %v1075_v3  ;;  %v1009_v59 = vpop.f32.mrb[7].mxu0  ;;  %v588_v61 = vsel %vm586_vm5, %v582_v60, 0 }
  0xf3   : > { %1017 = vmatpush3.bf16.msra.mxu0 %v588_v61 }
  0xf4   : > { %1028 = vmatprep.subr.bf16.mxu0 %v1075_v3 }
 0x15b   : > { %v637_v35 = vpop.permute.xlu0 %636 }
 0x15c   : > { %v642_v36 = vsel %vm521_vm2, %v637_v35, 0 }
 0x15d   : > { %1023 = vmatpush3.bf16.xpose.msra.mxu1 %v642_v36 }
 0x15e   : > { %1034 = vmatprep.subr.bf16.mxu1 %v1075_v3 }
 0x15f   : > { %v634_v37 = vpop.permute.xlu0 %633 }
 0x164   : > { %1025 = vmatmul.mubr.msk.bf16.vlgmr.msra.gmra.mrb[8].mxu1 %vm521_vm2, %v634_v37 }
 0x165   : > { %1036 = vmatprep.mubr.msk.bf16.mxu1 %vm1076_vm0, %v1075_v3  ;;  %1035 = vmatpush3.bf16.msra.mxu1 %v747_v10 }
 0x1c4   : > { %v562_v39 = vpop.f32.mrb[4].mxu1 }
 0x1c5   : > { %v568_v40 = vsel %vm366_vm3, %v562_v39, -1e+09  ;;  %v1014_v41 = vpop.f32.mrb[5].mxu1 }
 0x1c6   : > { %v565_v42 = vpop.f32.mrb[6].mxu1  ;;  %v570_v43 = vsel %vm569_vm4, %v568_v40, -inf }
 0x1c7   : > { %571 = vmax.xlane.f32.xlu1 %v570_v43  ;;  %v1015_v44 = vpop.f32.mrb[7].mxu1 }
 0x237   : > { %v678_v45 = vpop.f32.mrb[8].mxu1 }
 0x238   : > { %v684_v46 = vsel %vm366_vm3, %v678_v45, -1e+09  ;;  %v1026_v47 = vpop.f32.mrb[9].mxu1 }
 0x239   : > { %v681_v48 = vpop.f32.mrb[10].mxu1  ;;  %v685_v49 = vsel %vm569_vm4, %v684_v46, -inf }
 0x23a   : > { %686 = vmax.xlane.f32.xlu1 %v685_v49  ;;  %v1027_v50 = vpop.f32.mrb[11].mxu1 }
 0x254   : > { %v572_v51 = vpop.xlane.xlu1 %571 }
 0x255   : > { %v573_v52 = vsub.f32 %v568_v40, %v572_v51  ;;  %v962_v51 = vld [vmem:[%s1277_s8] ss:$0 sm:$0xff] }
 0x257   : > { %v574_v53 = vmul.f32 1.442695, %v573_v52 }
 0x259   : > { %1057 = vpow2.f32 %v574_v53 }
 0x263   : > { %v1058_v54 = vpop.eup %1057 }
 0x264   : > { %v576_v55 = vsel %vm569_vm4, %v1058_v54, 0.0 }
 0x265   : > { %577 = vadd.xlane.f32.xlu0 %v576_v55 }
 0x2c7   : > { %v687_v62 = vpop.xlane.xlu1 %686 }
 0x2c8   : > { %v688_v63 = vsub.f32 %v684_v46, %v687_v62 }
 0x2ca   : > { %v689_v0 = vmul.f32 1.442695, %v688_v63 }
 0x2cc   : > { %1059 = vpow2.f32 %v689_v0 }
 0x2d6   : > { %v1060_v1 = vpop.eup %1059 }
 0x2d7   : > { %v691_v2 = vsel %vm569_vm4, %v1060_v1, 0.0 }
 0x2d8   : > { %692 = vadd.xlane.f32.xlu1 %v691_v2 }
 0x2e9   : > { %698 = vrot.lane.b32.xlu1 %v582_v60, %s1077_s10 }
 0x2f2   : > { %v578_v4 = vpop.xlane.xlu0 %577 }
 0x2f3   : > { %1061 = vrcp.f32 %v578_v4 }
 0x2fd   : > { %v1062_v5 = vpop.eup %1061 }
 0x2fe   : > { %v580_v6 = vmul.f32 %v1062_v5, %v1058_v54 }
 0x300   : > { %v581_v7 = vpack.c.bf16 %v580_v6, %v580_v6 }
 0x302   : > { %1019 = vmatmul.mubr.msk.bf16.vlgmr.msra.gmra.mrb[8].mxu0 %vm569_vm4, %v581_v7 }
 0x303   : > { %1030 = vmatprep.mubr.msk.bf16.mxu0 %vm1076_vm0, %v1075_v3 }
 0x365   : > { %v693_v11 = vpop.xlane.xlu1 %692 }
 0x366   : > { %1063 = vrcp.f32 %v693_v11 }
 0x369   : > { %v699_v12 = vpop.permute.xlu1 %698 }
 0x36a   : > { %v704_v13 = vsel %vm586_vm5, %v699_v12, 0 }
 0x36b   : > { %1029 = vmatpush3.bf16.msra.mxu0 %v704_v13 }
 0x36c   : > { %1040 = vmatprep.subr.bf16.mxu0 %v1075_v3 }
 0x370   : > { %v1064_v17 = vpop.eup %1063 }
 0x371   : > { %v695_v18 = vmul.f32 %v1064_v17, %v1060_v1 }
 0x373   : > { %v696_v20 = vpack.c.bf16 %v695_v18, %v695_v18 }
 0x375   : > { %1031 = vmatmul.mubr.msk.bf16.vlgmr.msra.gmra.mrb[12].mxu0 %vm569_vm4, %v696_v20 }
 0x376   : > { %1041 = vmatpush3.bf16.msra.mxu0 %v631_v19  ;;  %1042 = vmatprep.mubr.msk.bf16.mxu0 %vm1076_vm0, %v1075_v3 }
 0x3d5   : > { %v624_v21 = vpop.f32.mrb[8].mxu0 }
 0x3d6   : > { %v630_v22 = vpack.c.bf16 %v624_v21, %v624_v21  ;;  %v1020_v23 = vpop.f32.mrb[9].mxu0 }
 0x3d7   : > { %v627_v24 = vpop.f32.mrb[10].mxu0 }
 0x3d8   : > { %v1021_v25 = vpop.f32.mrb[11].mxu0  ;;  %1043 = vmatmul.mubr.msk.bf16.vlgmr.msra.gmra.mrb[16].mxu0 %vm521_vm2, %v630_v22 }
 0x448   : > { %v740_v26 = vpop.f32.mrb[12].mxu0 }
 0x449   : > { %v746_v27 = vpack.c.bf16 %v740_v26, %v740_v26  ;;  %v1032_v28 = vpop.f32.mrb[13].mxu0 }
 0x44a   : > { %v743_v29 = vpop.f32.mrb[14].mxu0 }
 0x44b   : > { %v1033_v30 = vpop.f32.mrb[15].mxu0  ;;  %1037 = vmatmul.mubr.msk.bf16.vlgmr.msra.gmra.mrb[12].mxu1 %vm521_vm2, %v746_v27 }
 0x4ab   : > { %v828_v31 = vpop.f32.mrb[16].mxu0 }
 0x4ac   : > { %v1044_v32 = vpop.f32.mrb[17].mxu0 }
 0x4ad   : > { %v831_v33 = vpop.f32.mrb[18].mxu0 }
 0x4ae   : > { %v1045_v34 = vpop.f32.mrb[19].mxu0 }
 0x51e   : > { %v785_v35 = vpop.f32.mrb[12].mxu1 }
 0x51f   : > { %v829_v3 = vadd.f32 %v828_v31, %v785_v35  ;;  %v1038_v36 = vpop.f32.mrb[13].mxu1 }
 0x520   : > { %v788_v37 = vpop.f32.mrb[14].mxu1 }
 0x521   : > { %v1039_v38 = vpop.f32.mrb[15].mxu1  ;;  %v834_v39 = vadd.f32 %v829_v3, %v1178_v15  ;;  %v961_v15 = vld [vmem:[%s1276_s7] ss:$0 sm:$0xff] }
 0x523   : > { %v835_v40 = vsel %vm374_vm1, %v834_v39, 0.0 }
 0x524   : > { %836 = vadd.xlane.f32.xlu1 %v835_v40 }
 0x5b1   : > { %v837_v41 = vpop.xlane.xlu1 %836 }
 0x5b2   : > { %v839_v42 = vmul.f32 0.03125, %v837_v41 }
 0x5b4   : > { %v840_v43 = vsub.f32 %v834_v39, %v839_v42 }
 0x5b6   : > { %v841_v44 = vmul.f32 %v840_v43, %v840_v43 }
 0x5b8   : > { %v842_v45 = vsel %vm374_vm1, %v841_v44, 0.0 }
 0x5b9   : > { %843 = vadd.xlane.f32.xlu0 %v842_v45 }
 0x646   : > { %v844_v46 = vpop.xlane.xlu0 %843 }
 0x647   : > { %v845_v47 = vmul.f32 0.03125, %v844_v46 }
 0x649   : > { %v846_v48 = vadd.f32 1e-06, %v845_v47 }
 0x64b   : > { %1065 = vrsqrt.f32 %v846_v48 }
 0x655   : > { %v1066_v49 = vpop.eup %1065 }
 0x656   : > { %v848_v50 = vmul.f32 %v1066_v49, %v840_v43 }
 0x658   : > { %v856_v52 = vmul.f32 %v961_v15, %v848_v50 }
 0x65a   : > { %v864_v53 = vadd.f32 %v962_v51, %v856_v52 }
 0x65c   : > { %865 = vst.msk [vmem:[%s361_s21] sm:$0xff] %vm374_vm1, %v864_v53 }
 0x65d PF: > { %s19_s30 = sadd.s32 1, %s1073_s30  }
 0x65e   : > { %p16_p4 = scmp.ge.s32.totalorder %s19_s30, 4  }
 0x660   :  { %18 = sbr.rel (!%p16_p4) target bundleno = 1 (0x1), region = 92 }

</bundles_post_ra>
